<compile_context>
chip_gen: v5e
topology: v5e:2x2
jax: 0.10.0
libtpu: 0.0.40
codegen_flags: <defaults>
</compile_context>

<pallas_src>
import functools

import numpy as np
import jax
import jax.numpy as jnp
from jax.experimental import pallas as pl
from jax.experimental.pallas import tpu as pltpu


def _pick_lane_tile(total, target):
    """Largest divisor of `total` that is <= target, preferring multiples of 128.

    Always returns a divisor (grids divide evenly) and never exceeds `target` when
    total > target, so VMEM stays bounded even for odd spatial sizes.
    """
    total = int(total)
    target = int(max(target, 1))
    if total <= target:
        return total
    best128, best = 0, 1
    d = 1
    while d * d <= total:
        if total % d == 0:
            for cand in (d, total // d):
                if cand <= target:
                    if cand % 128 == 0 and cand > best128:
                        best128 = cand
                    if cand > best:
                        best = cand
        d += 1
    return best128 if best128 else best


def _mosaic_params(semantics, est_vmem_bytes):
    """dimension_semantics plus an explicit scoped-VMEM limit only when the estimated
    footprint exceeds the smallest per-generation scoped default (v5e: 16 MiB)."""
    limit = None
    if est_vmem_bytes > 12 * 2**20:
        limit = int(min(max(est_vmem_bytes * 3 // 2, 32 * 2**20), 96 * 2**20))
    return pltpu.CompilerParams(dimension_semantics=semantics,
                                vmem_limit_bytes=limit)


# --------------------------------------------------------------------------
# Kernel A: fused  offset^T = (W_off^T @ x) * sigmoid(W_scope^T @ x) * 0.5 + init_pos
# Layout (channels, pixels): pixel axis lane-dense, x read straight from NCHW.
# --------------------------------------------------------------------------
def _offset_kernel(x_ref, w_ref, b_ref, p_ref, o_ref, *, O):
    x = x_ref[...]                                                      # (C, T)
    r = jnp.dot(w_ref[...], x, preferred_element_type=jnp.float32)     # (2*O, T)
    off_lin = r[:O, :] + b_ref[...]                                    # (O, T)
    # sigmoid via exp + approximate reciprocal (both on the EUP slot)
    gate = pl.reciprocal(1.0 + jnp.exp(-r[O:, :]), approx=True)
    o_ref[...] = (off_lin * gate * 0.5 + p_ref[...]).astype(o_ref.dtype)


def offset_conv(x3, w_cat_t, b_off, init_pos, *, lane_tile=4096):
    B, C, HW = x3.shape
    O2 = w_cat_t.shape[0]
    O = O2 // 2
    T = _pick_lane_tile(HW, lane_tile)
    est = (2 * C * T + 2 * O * T + O2 * T + 2 * O2 * C + 4 * O) * 4
    kern = functools.partial(_offset_kernel, O=O)
    return pl.pallas_call(
        kern,
        out_shape=jax.ShapeDtypeStruct((B, O, HW), jnp.float32),
        grid_spec=pltpu.PrefetchScalarGridSpec(
            num_scalar_prefetch=0,
            grid=(B, HW // T),
            in_specs=[
                pl.BlockSpec((None, C, T), lambda b, t: (b, 0, t)),
                pl.BlockSpec((O2, C), lambda b, t: (0, 0)),
                pl.BlockSpec((O, 1), lambda b, t: (0, 0)),
                pl.BlockSpec((O, 1), lambda b, t: (0, 0)),
            ],
            out_specs=pl.BlockSpec((None, O, T), lambda b, t: (b, 0, t)),
        ),
        compiler_params=_mosaic_params(("parallel", "parallel"), est),
    )(x3, w_cat_t, b_off, init_pos)


# --------------------------------------------------------------------------
# Kernel B: fused bilinear grid_sample (border padding) + end 1x1 conv.
#   samp_g = x_g @ M_{b,g,tile}      (Cg, T)   -- bf16 on the MXU, f32 accumulate
#   out[b,:,tile] = sum_g W_g^T @ samp_g + bias
# M is built with the closed form max(0,1-|col-sx|)*max(0,1-|row-sy|) directly in
# flat (HW, T) form; the per-batch feature slab stays resident across (t, g) steps;
# groups accumulate into an f32 VMEM scratch, stored once at the last group.
# --------------------------------------------------------------------------
def _sample_end_conv_kernel(src_ref, rc_ref, xg_ref, w_ref, b_ref, o_ref,
                            acc_ref, *, H, W, G, xg_resident):
    g = pl.program_id(2)
    src = src_ref[...]                                       # (2, T) f32
    sx = jnp.clip(src[0:1, :], 0.0, float(W - 1))            # (1, T) border clamp
    sy = jnp.clip(src[1:2, :], 0.0, float(H - 1))
    colf = rc_ref[:, 0:1]                                    # (HW, 1) input-pixel col
    rowf = rc_ref[:, 1:2]                                    # (HW, 1) input-pixel row
    # closed-form bilinear weights (identical to the clamped one-hot construction)
    mx = jnp.maximum(1.0 - jnp.abs(colf - sx), 0.0)          # (HW, T)
    my = jnp.maximum(1.0 - jnp.abs(rowf - sy), 0.0)          # (HW, T)
    m = (mx * my).astype(jnp.bfloat16)                       # (HW, T)
    # sample the raw Cg group channels first, then fold in the tiny end-conv matmul
    xg = xg_ref[g] if xg_resident else xg_ref[...]           # (Cg, HW) bf16
    samp = jnp.dot(xg, m, preferred_element_type=jnp.float32)              # (Cg, T)
    contrib = jnp.dot(w_ref[g], samp, preferred_element_type=jnp.float32)  # (out_ch, T)

    @pl.when(g == 0)
    def _init():
        acc_ref[...] = contrib + b_ref[...]

    @pl.when(g > 0)
    def _accum():
        acc_ref[...] += contrib

    @pl.when(g == G - 1)
    def _store():
        o_ref[...] = acc_ref[...].astype(o_ref.dtype)


def sample_end_conv(src, xg, w_end_g, b_end, *, H, W, lane_tile=512):
    B, G, _, sHW = src.shape
    _, _, Cg, HW = xg.shape
    out_ch = w_end_g.shape[1]
    # Cap T so each (HW, T) f32 bilinear-weight temporary stays around <= 2 MiB.
    t_cap = max(128, ((2 * 1024 * 1024) // max(HW * 4, 1)) // 128 * 128)
    T = _pick_lane_tile(sHW, min(lane_tile, t_cap))
    # keep the tile axis > 1 when B == 1 so v7x's two TensorCores both get work
    if B == 1 and sHW // T < 2:
        T = _pick_lane_tile(sHW, max(128, T // 2))
    n_t = sHW // T
    # Input-pixel (col, row) coordinates: fetched once, resident (constant block index).
    hw = jnp.arange(HW, dtype=jnp.int32)
    rc = jnp.stack([(hw % W).astype(jnp.float32),
                    (hw // W).astype(jnp.float32)], axis=1)             # (HW, 2)
    # Keep the whole per-batch feature slab resident across (tile, group) steps when it
    # fits the VMEM budget; otherwise stream one group block per step.
    xg_resident = 2 * G * Cg * HW * xg.dtype.itemsize <= 16 * 2**20
    if xg_resident:
        xg_spec = pl.BlockSpec((None, G, Cg, HW), lambda b, t, g: (b, 0, 0, 0))
        xg_block = G * Cg * HW
    else:
        # TODO(synk): for slabs that do not fit, moving the group axis outside the tile
        # axis would cut the remaining HBM re-reads; kept simple here.
        xg_spec = pl.BlockSpec((None, None, Cg, HW), lambda b, t, g: (b, g, 0, 0))
        xg_block = Cg * HW
    est = (2 * xg_block * xg.dtype.itemsize
           + (2 * 2 * T + 3 * out_ch * T + 2 * HW * 128 + 5 * HW * T
              + Cg * T + 2 * G * out_ch * Cg) * 4)
    kern = functools.partial(_sample_end_conv_kernel, H=H, W=W, G=G,
                             xg_resident=xg_resident)
    return pl.pallas_call(
        kern,
        out_shape=jax.ShapeDtypeStruct((B, out_ch, sHW), jnp.float32),
        grid_spec=pltpu.PrefetchScalarGridSpec(
            num_scalar_prefetch=0,
            grid=(B, n_t, G),
            in_specs=[
                pl.BlockSpec((None, None, 2, T), lambda b, t, g: (b, g, 0, t)),
                pl.BlockSpec((HW, 2), lambda b, t, g: (0, 0)),
                xg_spec,
                pl.BlockSpec((G, out_ch, Cg), lambda b, t, g: (0, 0, 0)),
                pl.BlockSpec((out_ch, 1), lambda b, t, g: (0, 0)),
            ],
            out_specs=pl.BlockSpec((None, out_ch, T), lambda b, t, g: (b, 0, t)),
            scratch_shapes=[pltpu.VMEM((out_ch, T), jnp.float32)],
        ),
        compiler_params=_mosaic_params(("parallel", "parallel", "arbitrary"), est),
    )(src, rc, xg, w_end_g, b_end)


# --------------------------------------------------------------------------
# DySample module glue
# --------------------------------------------------------------------------
def init_pos_buffer(scale, groups):
    """Replicates DySample._init_pos (channel order d*G*s*s + g*s*s + i*s + j)."""
    h = (np.arange(scale, dtype=np.float32) - (scale - 1) / 2.0) / scale
    g0, g1 = np.meshgrid(h, h, indexing="ij")
    t = np.stack([g0, g1])                 # (2, s, s)
    t = t.transpose(0, 2, 1)               # torch .transpose(1, 2)
    t = np.tile(t, (1, groups, 1))         # (2, s*groups, s)
    return t.reshape(-1).astype(np.float32)


def dysample_forward(x, params, *, scale, groups, end_convolution=True):
    B, C, H, W = x.shape
    s, G = scale, groups
    Cg = C // G
    sH, sW = s * H, s * W
    HW, sHW = H * W, sH * sW
    O = 2 * G * s * s

    # --- kernel A: fused offset/scope 1x1 convs on the (channels, pixels) layout
    x3 = x.reshape(B, C, HW)
    w_cat_t = jnp.concatenate([params["w_off"], params["w_scope"]], axis=1).T   # (2O, C)
    b_off = params["b_off"].reshape(O, 1)
    ipos = params["init_pos"].reshape(O, 1)
    off_t = offset_conv(x3, w_cat_t, b_off, ipos)                               # (B, O, HW)

    # --- pixel-shuffle / coordinate bookkeeping on the SMALL offset tensor (XLA glue).
    #     With align_corners=False the PyTorch normalized-grid math reduces exactly to
    #     src_x = w + off_x, src_y = h + off_y in input-pixel coordinates.
    off7 = off_t.reshape(B, 2, G, s, s, H, W)
    offp = jnp.transpose(off7, (0, 2, 1, 5, 3, 6, 4)).reshape(B, G, 2, sH, sW)
    bx = jnp.broadcast_to((jnp.arange(sW) // s).astype(jnp.float32)[None, :], (sH, sW))
    by = jnp.broadcast_to((jnp.arange(sH) // s).astype(jnp.float32)[:, None], (sH, sW))
    base = jnp.stack([bx, by], axis=0)                                          # (2, sH, sW)
    src = (offp + base[None, None]).reshape(B, G, 2, sHW)

    # --- kernel B: fused bilinear grid_sample (border) + end 1x1 conv, output in NCHW
    if end_convolution:
        w_end, b_end = params["w_end"], params["b_end"]
    else:
        # grid_sample output only: identity end conv reproduces the grouped concat
        w_end = jnp.eye(C, dtype=jnp.float32)
        b_end = jnp.zeros((1, C), jnp.float32)
    out_ch = w_end.shape[1]
    w_end_g = w_end.reshape(G, Cg, out_ch).transpose(0, 2, 1)                   # (G, out_ch, Cg)
    b_end_c = b_end.reshape(out_ch, 1)
    xg = x.reshape(B, G, Cg, HW).astype(jnp.bfloat16)    # bf16 operand of the sampling matmul
    out = sample_end_conv(src, xg, w_end_g, b_end_c, H=H, W=W)                  # (B, out_ch, sHW)
    return out.reshape(B, out_ch, sH, sW)                                       # NCHW


# --------------------------------------------------------------------------
# Pure-JAX f32 reference (same math, no Pallas) for a numerical sanity check.
# --------------------------------------------------------------------------
def dysample_reference(x, params, *, scale, groups):
    B, C, H, W = x.shape
    s, G = scale, groups
    Cg = C // G
    sH, sW = s * H, s * W
    xp = x.transpose(0, 2, 3, 1).reshape(-1, C)
    off_lin = xp @ params["w_off"] + params["b_off"]
    sc_lin = xp @ params["w_scope"]
    off = off_lin * jax.nn.sigmoid(sc_lin) * 0.5 + params["init_pos"]
    off7 = off.reshape(B, H, W, 2, G, s, s)
    offg = off7.transpose(0, 4, 1, 5, 2, 6, 3).reshape(B, G, sH, sW, 2)
    base_x = (jnp.arange(sW) // s).astype(jnp.float32)[None, :]
    base_y = (jnp.arange(sH) // s).astype(jnp.float32)[:, None]
    sx = jnp.clip(base_x + offg[..., 0], 0.0, W - 1)
    sy = jnp.clip(base_y + offg[..., 1], 0.0, H - 1)
    x0 = jnp.floor(sx); y0 = jnp.floor(sy)
    fx = sx - x0; fy = sy - y0
    x0i = x0.astype(jnp.int32); y0i = y0.astype(jnp.int32)
    x1i = jnp.minimum(x0i + 1, W - 1); y1i = jnp.minimum(y0i + 1, H - 1)
    xg = x.reshape(B * G, Cg, H * W)

    def gather(yi, xi):
        idx = (yi * W + xi).reshape(B * G, 1, sH * sW)
        return jnp.take_along_axis(xg, jnp.broadcast_to(idx, (B * G, Cg, sH * sW)), axis=2)

    fxr = fx.reshape(B * G, 1, sH * sW); fyr = fy.reshape(B * G, 1, sH * sW)
    v = (gather(y0i, x0i) * (1 - fxr) * (1 - fyr) + gather(y0i, x1i) * fxr * (1 - fyr)
         + gather(y1i, x0i) * (1 - fxr) * fyr + gather(y1i, x1i) * fxr * fyr)
    yp = v.reshape(B, G, Cg, sH, sW).transpose(0, 3, 4, 1, 2).reshape(-1, C)
    out = yp @ params["w_end"] + params["b_end"]
    out_ch = params["w_end"].shape[1]
    return out.reshape(B, sH, sW, out_ch).transpose(0, 3, 1, 2)


if __name__ == "__main__":
    B, C, H, W = 2, 8, 16, 16
    scale, groups, out_ch = 2, 4, 8
    O = 2 * groups * scale * scale  # 32

    key = jax.random.PRNGKey(0)
    k = jax.random.split(key, 6)
    x = jax.random.normal(k[0], (B, C, H, W), jnp.float32)

    # Deterministic synthetic parameters (1x1 conv weights stored as (C_in, C_out)).
    params = {
        "w_off": 0.02 * jax.random.normal(k[1], (C, O), jnp.float32),
        "b_off": 0.02 * jax.random.normal(k[2], (1, O), jnp.float32),
        "w_scope": 0.02 * jax.random.normal(k[3], (C, O), jnp.float32),
        "init_pos": jnp.asarray(init_pos_buffer(scale, groups))[None, :],   # (1, 32)
        "w_end": jax.random.normal(k[4], (C, out_ch), jnp.float32) / np.sqrt(C),
        "b_end": 0.01 * jax.random.normal(k[5], (1, out_ch), jnp.float32),
    }

    out = dysample_forward(x, params, scale=scale, groups=groups)
    out = jax.block_until_ready(out)

    ref = dysample_reference(x, params, scale=scale, groups=groups)
    assert out.shape == (B, out_ch, scale * H, scale * W)
    # Tolerance sized for the bf16 sampling matmul (f32 accumulation); structural bugs
    # would produce O(1) errors and still fail this check.
    np.testing.assert_allclose(np.asarray(out), np.asarray(ref), atol=5e-2, rtol=5e-2)
    print("KERNEL_OK")
</pallas_src>

<mosaic_0001>
module attributes {stable_mosaic.version = 11 : i64} {
  func.func @_offset_kernel(%arg0: i32, %arg1: i32, %arg2: memref<1x8x256xf32, #tpu.memory_space<vmem>>, %arg3: memref<64x8xf32, #tpu.memory_space<vmem>>, %arg4: memref<32x1xf32, #tpu.memory_space<vmem>>, %arg5: memref<32x1xf32, #tpu.memory_space<vmem>>, %arg6: memref<1x32x256xf32, #tpu.memory_space<vmem>>) attributes {dimension_semantics = [#tpu.dimension_semantics<parallel>, #tpu.dimension_semantics<parallel>], iteration_bounds = array<i64: 2, 1>, scalar_prefetch = 0 : i64, scratch_operands = 0 : i64, tpu.core_type = #tpu.core_type<tc>, window_params = [{transform_indices = @transform_0, window_bounds = array<i64: 1, 8, 256>}, {pipeline_mode = #tpu.pipeline_mode<synchronous>, transform_indices = @transform_1, window_bounds = array<i64: 64, 8>}, {pipeline_mode = #tpu.pipeline_mode<synchronous>, transform_indices = @transform_2, window_bounds = array<i64: 32, 1>}, {pipeline_mode = #tpu.pipeline_mode<synchronous>, transform_indices = @transform_3, window_bounds = array<i64: 32, 1>}, {transform_indices = @transform_4, window_bounds = array<i64: 1, 32, 256>}]} {
    %c0 = arith.constant 0 : index
    %c0_0 = arith.constant 0 : index
    %c0_1 = arith.constant 0 : index
    %0 = vector.load %arg2[%c0, %c0_0, %c0_1] : memref<1x8x256xf32, #tpu.memory_space<vmem>>, vector<1x8x256xf32>
    %1 = vector.shape_cast %0 : vector<1x8x256xf32> to vector<8x256xf32>
    %c0_2 = arith.constant 0 : index
    %c0_3 = arith.constant 0 : index
    %2 = vector.load %arg3[%c0_2, %c0_3] : memref<64x8xf32, #tpu.memory_space<vmem>>, vector<64x8xf32>
    %cst = arith.constant dense<0.000000e+00> : vector<64x256xf32>
    %3 = tpu.matmul %2, %1, %cst {dimension_numbers = #tpu.dot_dimension_numbers<[1], [0], [0], [1], [0, 0, 1, 1], [], []>} : vector<64x8xf32>, vector<8x256xf32>, vector<64x256xf32> -> vector<64x256xf32>
    %4 = vector.extract_strided_slice %3 {offsets = [0, 0], sizes = [32, 256], strides = [1, 1]} : vector<64x256xf32> to vector<32x256xf32>
    %c0_4 = arith.constant 0 : index
    %c0_5 = arith.constant 0 : index
    %5 = vector.load %arg4[%c0_4, %c0_5] : memref<32x1xf32, #tpu.memory_space<vmem>>, vector<32x1xf32>
    %6 = vector.broadcast %5 : vector<32x1xf32> to vector<32x256xf32>
    %7 = arith.addf %4, %6 : vector<32x256xf32>
    %8 = vector.extract_strided_slice %3 {offsets = [32, 0], sizes = [32, 256], strides = [1, 1]} : vector<64x256xf32> to vector<32x256xf32>
    %cst_6 = arith.constant 0.000000e+00 : f32
    %9 = vector.broadcast %cst_6 : f32 to vector<32x256xf32>
    %10 = arith.subf %9, %8 : vector<32x256xf32>
    %11 = math.exp %10 : vector<32x256xf32>
    %cst_7 = arith.constant 1.000000e+00 : f32
    %12 = vector.broadcast %cst_7 : f32 to vector<32x256xf32>
    %13 = arith.addf %12, %11 : vector<32x256xf32>
    %14 = tpu.reciprocal %13 {approx = true} : vector<32x256xf32> -> vector<32x256xf32>
    %15 = arith.mulf %7, %14 : vector<32x256xf32>
    %cst_8 = arith.constant 5.000000e-01 : f32
    %16 = vector.broadcast %cst_8 : f32 to vector<32x256xf32>
    %17 = arith.mulf %15, %16 : vector<32x256xf32>
    %c0_9 = arith.constant 0 : index
    %c0_10 = arith.constant 0 : index
    %18 = vector.load %arg5[%c0_9, %c0_10] : memref<32x1xf32, #tpu.memory_space<vmem>>, vector<32x1xf32>
    %19 = vector.broadcast %18 : vector<32x1xf32> to vector<32x256xf32>
    %20 = arith.addf %17, %19 : vector<32x256xf32>
    %c0_11 = arith.constant 0 : index
    %c0_12 = arith.constant 0 : index
    %c0_13 = arith.constant 0 : index
    %21 = vector.load %arg6[%c0_11, %c0_12, %c0_13] : memref<1x32x256xf32, #tpu.memory_space<vmem>>, vector<1x32x256xf32>
    %22 = vector.shape_cast %21 : vector<1x32x256xf32> to vector<32x256xf32>
    %23 = vector.shape_cast %20 : vector<32x256xf32> to vector<1x32x256xf32>
    tpu.vector_store %arg6[%c0_11, %c0_12, %c0_13], %23 {strides = array<i32>} : memref<1x32x256xf32, #tpu.memory_space<vmem>>, vector<1x32x256xf32>,
    return
  }
  func.func @transform_0(%arg0: i32, %arg1: i32) -> (i32, i32, i32) {
    %c0_i32 = arith.constant 0 : i32
    %c0_i32_0 = arith.constant 0 : i32
    return %arg0, %c0_i32, %arg1 : i32, i32, i32
  }
  func.func @transform_1(%arg0: i32, %arg1: i32) -> (i32, i32) {
    %c0_i32 = arith.constant 0 : i32
    %c0_i32_0 = arith.constant 0 : i32
    %c0_i32_1 = arith.constant 0 : i32
    return %c0_i32, %c0_i32_0 : i32, i32
  }
  func.func @transform_2(%arg0: i32, %arg1: i32) -> (i32, i32) {
    %c0_i32 = arith.constant 0 : i32
    %c0_i32_0 = arith.constant 0 : i32
    %c0_i32_1 = arith.constant 0 : i32
    return %c0_i32, %c0_i32_0 : i32, i32
  }
  func.func @transform_3(%arg0: i32, %arg1: i32) -> (i32, i32) {
    %c0_i32 = arith.constant 0 : i32
    %c0_i32_0 = arith.constant 0 : i32
    %c0_i32_1 = arith.constant 0 : i32
    return %c0_i32, %c0_i32_0 : i32, i32
  }
  func.func @transform_4(%arg0: i32, %arg1: i32) -> (i32, i32, i32) {
    %c0_i32 = arith.constant 0 : i32
    %c0_i32_0 = arith.constant 0 : i32
    return %arg0, %c0_i32, %arg1 : i32, i32, i32
  }
}

</mosaic_0001>

<bundles_post_ra>
// kernel: tpu_custom_call.1
= control target key start
LH: loop header
LB: loop body
LE: loop exit
PB: predicated region body
PF: predicated region fallthrough
CT: control target
= control target key end

     0   :  { %9 = vsyncpa [#allocation3], 0  ;;  %s979_s0 = inlined_call_operand.vmem [shape: f32[2,8,256], index: 0, kind: input, shape index: {}]   ;;  %s980_s1 = inlined_call_operand.vmem [shape: f32[64,8], index: 1, kind: input, shape index: {}]   ;;  %s981_s2 = inlined_call_operand.vmem [shape: f32[32,1], index: 2, kind: input, shape index: {}]   ;;  %s982_s3 = inlined_call_operand.vmem [shape: f32[32,1], index: 3, kind: input, shape index: {}]   ;;  %s983_s4 = inlined_call_operand.hbm [shape: f32[2,32,256], index: 4, kind: output, shape index: {}]  }
   0x1   :  { %11 = vsyncpa [#allocation3 + $0x1], 0  ;;  %s803_s15 = smov 0   ;;  %s805_s16 = smov 0  }
   0x2   :  { %s807_s17 = smov 0   ;;  %s809_s18 = smov 0  }
   0x3   :  { %s811_s19 = smov 0   ;;  %s813_s20 = smov 0  }
   0x4 LB: > { %s569_s21 = sadd.s32 4294967295, %s773_s20   ;;  %s570_s22 = sadd.s32 4294967294, %s773_s20   ;;  %s773_s20 = sphi %s813_s20, %s17_s20   ;;  %s769_s19 = sphi %s811_s19, %s990_s19   ;;  %s765_s18 = sphi %s809_s18, %s989_s18   ;;  %s761_s17 = sphi %s807_s17, %s988_s17   ;;  %s757_s16 = sphi %s805_s16, %s987_s16   ;;  %s753_s15 = sphi %s803_s15, %s986_s15  }
   0x5   : > { %s29_s23 = sadd.s32 1, %s769_s19  ;;  %s129_s24 = sadd.s32 1, %s761_s17 }
   0x6   : > { %p31_p0 = scmp.ge.s32.totalorder %s29_s23, 2  ;;  %p139_p1 = scmp.ne.s32.totalorder %s761_s17, %s757_s16 }
   0x7   : > { %p140_p2 = scmp.eq.s32.totalorder %s569_s21, 1  ;;  %p145_p3 = scmp.ne.s32.totalorder %s757_s16, %s753_s15 }
   0x8   : > { %s992_s23 = smov (%p31_p0, %s29_s23), 0  ;;  %p146_p5 = scmp.eq.s32.totalorder %s570_s22, 1 }
   0x9   : > { %p843_p4 = por %p140_p2, %p139_p1  ;;  %s124_s26 = ssub.s32 %s769_s19, %s992_s23 }
   0xa   : > { %p573_p6 = scmp.ge.s32.totalorder %s773_s20, 1  ;;  %p127_p7 = scmp.eq.s32.totalorder %s124_s26, 0 }
   0xb   : > { %p850_p8 = por %p146_p5, %p145_p3  ;;  %p186_p9 = scmp.lt.s32.totalorder %s773_s20, 3 }
   0xc   : > { %s856_s28 = scalar_select %p127_p7, %s761_s17, %s129_s24  }
   0xd   : > { %p187_p10 = pnand %p573_p6, %p186_p9 }
   0xe   : > { %p217_p11 = scmp.lt.s32.totalorder (!%p187_p10), %s765_s18, 1  ;;  %s599_s11 = sshll.u32 (!%p187_p10), %s765_s18, 6 }
   0xf   : > { %190 = sbr.rel (%p187_p10) target bundleno = 214 (0xd6), region = 36  ;;  %s486_s14 = scalar_lea.hbm (!%p187_p10), %s983_s4, %s599_s11 }
  0x10   : > { %s489_s21 = sshll.u32 (!%p187_p10), %s486_s14, 4  ;;  %s715_s5 = scalar_lea.hbm (!%p187_p10), %s983_s4, 128  ;;  %s490_s21 = int_to_ptr.hbm [resolvable:$true] %s489_s21 }
  0x11   : > { %s709_s24 = sshra.s32 (!%p187_p10), %s490_s21, 4  ;;  %s710_s24 = int_to_ptr.hbm [resolvable:$true] %s709_s24 }
  0x12   : > { %s711_s26 = scalar_lea.hbm (!%p187_p10), %s710_s24, 64  ;;  %p716_p1 = scmp.lt.s32.totalorder (!%p187_p10), %s710_s24, %s983_s4 }
  0x13   : > { %p712_p12 = scmp.ne.s32.totalorder (!%p187_p10), %s710_s24, %s711_s26  ;;  %p717_p2 = scmp.lt.s32.totalorder (!%p187_p10), %s715_s5, %s711_s26 }
  0x14   : > { %v775_v0 = vmov 0   ;;  %s218_s29 = scalar_select %p217_p11, %s765_s18, 1  ;;  %v346_v1 = vld [vmem:[%s981_s2 + $0x10] sm:$0xff]  ;;  %v344_v2 = vld [vmem:[%s981_s2] sm:$0xff]  ;;  %vm237_vm0 = vcmask 64512   ;;  %v347_v8 = vld [vmem:[%s981_s2 + $0x18] sm:$0xff] }
  0x15   : > { %661 = vset.pattern.permute.xlu1 %v775_v0  ;;  %660 = vset.pattern.permute.xlu0 %v775_v0  ;;  %v432_v3 = vld [vmem:[%s982_s3] sm:$0xff]  ;;  %v345_v9 = vld [vmem:[%s981_s2 + $0x8] sm:$0xff]  ;;  %v435_v13 = vld [vmem:[%s982_s3 + $0x18] sm:$0xff]  ;;  %p713_p13 = pnand %p712_p12, %p843_p4  ;;  %p718_p3 = por %p717_p2, %p716_p1 }
  0x16   : > { %662 = vset.pattern.permute.xlu2 %v775_v0  ;;  %360 = vperm.xlu1 %661, %v346_v1   ;;  %s598_s8 = sshll.u32 %s218_s29, 4  ;;  %v233_v4 = vld [vmem:[%s980_s1 + $0x20] sm:$0xff]  ;;  %v433_v10 = vld [vmem:[%s982_s3 + $0x8] sm:$0xff]  ;;  %v434_v14 = vld [vmem:[%s982_s3 + $0x10] sm:$0xff] }
  0x17   : > { %350 = vperm.xlu0 %660, %v344_v2   ;;  %s224_s13 = scalar_lea.vmem %s979_s0, %s598_s8  ;;  %438 = vperm.xlu2 %662, %v432_v3   ;;  %v229_v7 = vld [vmem:[%s980_s1] sm:$0xff]  ;;  %v234_v11 = vld [vmem:[%s980_s1 + $0x28] sm:$0xff]  ;;  %v235_v15 = vld [vmem:[%s980_s1 + $0x30] sm:$0xff]  ;;  %s213_s8 = sand.u32 1, %s757_s16  }
  0x18   : > { %v227_v5 = vld [vmem:[%s224_s13] sm:$0xff]  ;;  %v228_v6 = vld [vmem:[%s224_s13 + $0x8] sm:$0xff]  ;;  %v231_v16 = vld [vmem:[%s980_s1 + $0x10] sm:$0xff]  ;;  %s574_s9 = sshll.u32 %s213_s8, 6  ;;  %s473_s22 = scalar_lea.sflag [#allocation3], %s213_s8 }
  0x19   : > { %600 = vmatpush.msra.mxu2 %v227_v5  ;;  %601 = vmatpush.msra.mxu3 %v228_v6  ;;  %v230_v12 = vld [vmem:[%s980_s1 + $0x8] sm:$0xff]  ;;  %v236_v17 = vld [vmem:[%s980_s1 + $0x38] sm:$0xff]  ;;  %s930_s10 = scalar_lea.vmem [#allocation2], %s574_s9  ;;  %p714_p0 = pneg %p713_p13 }
  0x1a   : > { %581 = vmatmul.msk.f32.vlgmr.msra.gmra.mxu2 %vm237_vm0, %v233_v4  ;;  %589 = vmatmul.msk.f32.vlgmr.msra.gmra.mxu3 %vm237_vm0, %v233_v4  ;;  %v232_v18 = vld [vmem:[%s980_s1 + $0x18] sm:$0xff]  ;;  %s487_s18 = sshll.u32 %s930_s10, 4  ;;  %s488_s18 = int_to_ptr.vmem [resolvable:$true] %s487_s18 }
  0x1b   : > { %277 = vmatpush.msra.mxu0 %v227_v5  ;;  %318 = vmatpush.msra.mxu1 %v228_v6  ;;  %p719_p5 = pnand %p718_p3, %p714_p0 }
  0x1c   : > { %577 = vmatmul.msk.f32.vlgmr.msra.gmra.mxu0 %vm237_vm0, %v229_v7  ;;  %585 = vmatmul.msk.f32.vlgmr.msra.gmra.mxu1 %vm237_vm0, %v229_v7 }
  0x1e   : > { %365 = vperm.xlu1 %661, %v347_v8  }
  0x1f   : > { %355 = vperm.xlu0 %660, %v345_v9   ;;  %443 = vperm.xlu2 %662, %v433_v10  }
  0x22   : > { %582 = vmatmul.msk.f32.gmra.mxu2 %vm237_vm0, %v234_v11  ;;  %590 = vmatmul.msk.f32.gmra.mxu3 %vm237_vm0, %v234_v11 }
  0x24   : > { %578 = vmatmul.msk.f32.gmra.mxu0 %vm237_vm0, %v230_v12  ;;  %586 = vmatmul.msk.f32.gmra.mxu1 %vm237_vm0, %v230_v12 }
  0x26   : > { %453 = vperm.xlu1 %661, %v435_v13  }
  0x27   : > { %448 = vperm.xlu0 %660, %v434_v14  }
  0x2a   : > { %583 = vmatmul.msk.f32.gmra.mxu2 %vm237_vm0, %v235_v15  ;;  %591 = vmatmul.msk.f32.gmra.mxu3 %vm237_vm0, %v235_v15 }
  0x2c   : > { %579 = vmatmul.msk.f32.gmra.mxu0 %vm237_vm0, %v231_v16  ;;  %587 = vmatmul.msk.f32.gmra.mxu1 %vm237_vm0, %v231_v16 }
  0x32   : > { %584 = vmatmul.msk.f32.gmra.mxu2 %vm237_vm0, %v236_v17  ;;  %592 = vmatmul.msk.f32.gmra.mxu3 %vm237_vm0, %v236_v17 }
  0x34   : > { %580 = vmatmul.msk.f32.gmra.mxu0 %vm237_vm0, %v232_v18  ;;  %588 = vmatmul.msk.f32.gmra.mxu1 %vm237_vm0, %v232_v18 }
  0x71   : > { %v439_v50 = vpop.permute.xlu2 %438 }
  0x79   : > { %v444_v14 = vpop.permute.xlu2 %443 }
  0x88   : > { %v361_v7 = vpop.permute.xlu1 %360 }
  0x89   : > { %v351_v37 = vpop.permute.xlu0 %350 }
  0x91   : > { %v356_v58 = vpop.permute.xlu0 %355 }
  0x99   : > { %v279_v29 = vpop.f32.mrf.mxu0  ;;  %v320_v34 = vpop.f32.mrf.mxu1 }
  0x9a   : > { %v368_v40 = vadd.f32 %v351_v37, %v279_v29  ;;  %v369_v43 = vadd.f32 %v351_v37, %v320_v34  ;;  %v449_v34 = vpop.permute.xlu0 %448 }
  0x9d   : > { %v291_v19 = vpop.f32.mrf.mxu2  ;;  %v332_v20 = vpop.f32.mrf.mxu3 }
  0x9e   : > { %v376_v21 = vsub.f32 0.0, %v291_v19  ;;  %v377_v22 = vsub.f32 0.0, %v332_v20 }
  0xa0   : > { %v384_v23 = vmul.f32 1.442695, %v376_v21  ;;  %v386_v24 = vmul.f32 1.442695, %v377_v22 }
  0xa1   : > { %v282_v49 = vpop.f32.mrf.mxu0  ;;  %v323_v55 = vpop.f32.mrf.mxu1 }
  0xa2   : > { %663 = vpow2.f32 %v384_v23  ;;  %v370_v60 = vadd.f32 %v356_v58, %v282_v49  ;;  %v371_v9 = vadd.f32 %v356_v58, %v323_v55 }
  0xa3   : > { %665 = vpow2.f32 %v386_v24 }
  0xa5   : > { %v294_v25 = vpop.f32.mrf.mxu2  ;;  %v335_v26 = vpop.f32.mrf.mxu3 }
  0xa6   : > { %v378_v27 = vsub.f32 0.0, %v294_v25  ;;  %v379_v28 = vsub.f32 0.0, %v335_v26 }
  0xa8   : > { %v664_v30 = vpop.eup %663  ;;  %v388_v31 = vmul.f32 1.442695, %v378_v27  ;;  %v390_v35 = vmul.f32 1.442695, %v379_v28 }
  0xa9   : > { %v666_v32 = vpop.eup %665  ;;  %v400_v33 = vadd.f32 1.0, %v664_v30  ;;  %v285_v13 = vpop.f32.mrf.mxu0 }
  0xaa   : > { %v401_v36 = vadd.f32 1.0, %v666_v32  ;;  %667 = vpow2.f32 %v388_v31  ;;  %v326_v17 = vpop.f32.mrf.mxu1  ;;  %v372_v22 = vadd.f32 %v361_v7, %v285_v13  ;;  %v366_v30 = vpop.permute.xlu1 %365 }
  0xab   : > { %669 = vrcp.f32 %v400_v33  ;;  %v373_v28 = vadd.f32 %v361_v7, %v326_v17 }
  0xac   : > { %671 = vrcp.f32 %v401_v36 }
  0xad   : > { %673 = vpow2.f32 %v390_v35  ;;  %v297_v38 = vpop.f32.mrf.mxu2  ;;  %v338_v39 = vpop.f32.mrf.mxu3 }
  0xae   : > { %v380_v41 = vsub.f32 0.0, %v297_v38  ;;  %v381_v42 = vsub.f32 0.0, %v338_v39 }
  0xb0   : > { %v668_v44 = vpop.eup %667  ;;  %v392_v45 = vmul.f32 1.442695, %v380_v41  ;;  %v394_v46 = vmul.f32 1.442695, %v381_v42 }
  0xb1   : > { %v670_v47 = vpop.eup %669  ;;  %v402_v48 = vadd.f32 1.0, %v668_v44  ;;  %v288_v35 = vpop.f32.mrf.mxu0 }
  0xb2   : > { %v672_v51 = vpop.eup %671  ;;  %v416_v52 = vmul.f32 %v670_v47, %v368_v40  ;;  %675 = vpow2.f32 %v392_v45  ;;  %v329_v38 = vpop.f32.mrf.mxu1  ;;  %v374_v40 = vadd.f32 %v366_v30, %v288_v35 }
  0xb3   : > { %v674_v53 = vpop.eup %673  ;;  %677 = vrcp.f32 %v402_v48  ;;  %v417_v54 = vmul.f32 %v672_v51, %v369_v43  ;;  %v375_v43 = vadd.f32 %v366_v30, %v329_v38  ;;  %v454_v47 = vpop.permute.xlu1 %453 }
  0xb4   : > { %v403_v56 = vadd.f32 1.0, %v674_v53  ;;  %679 = vpow2.f32 %v394_v46  ;;  %v424_v57 = vmul.f32 0.5, %v416_v52 }
  0xb5   : > { %v425_v59 = vmul.f32 0.5, %v417_v54  ;;  %v300_v61 = vpop.f32.mrf.mxu2  ;;  %v341_v62 = vpop.f32.mrf.mxu3 }
  0xb6   : > { %681 = vrcp.f32 %v403_v56  ;;  %v456_v63 = vadd.f32 %v439_v50, %v424_v57  ;;  %v382_v0 = vsub.f32 0.0, %v300_v61  ;;  %v383_v1 = vsub.f32 0.0, %v341_v62 }
  0xb7   : > { %v457_v2 = vadd.f32 %v439_v50, %v425_v59 }
  0xb8   : > { %v676_v3 = vpop.eup %675  ;;  %464 = vst [vmem:[%s930_s10] sm:$0xff] %v456_v63  ;;  %v396_v4 = vmul.f32 1.442695, %v382_v0  ;;  %v398_v5 = vmul.f32 1.442695, %v383_v1 }
  0xb9   : > { %v678_v6 = vpop.eup %677  ;;  %v404_v8 = vadd.f32 1.0, %v676_v3  ;;  %465 = vst [vmem:[%s930_s10 + $0x8] sm:$0xff] %v457_v2 }
  0xba   : > { %v680_v10 = vpop.eup %679  ;;  %683 = vpow2.f32 %v396_v4  ;;  %v418_v11 = vmul.f32 %v678_v6, %v370_v60 }
  0xbb   : > { %685 = vrcp.f32 %v404_v8  ;;  %v405_v12 = vadd.f32 1.0, %v680_v10 }
  0xbc   : > { %v682_v15 = vpop.eup %681  ;;  %687 = vpow2.f32 %v398_v5  ;;  %v426_v16 = vmul.f32 0.5, %v418_v11 }
  0xbd   : > { %689 = vrcp.f32 %v405_v12  ;;  %v419_v18 = vmul.f32 %v682_v15, %v371_v9 }
  0xbe   : > { %v458_v19 = vadd.f32 %v444_v14, %v426_v16 }
  0xbf   : > { %v427_v20 = vmul.f32 0.5, %v419_v18 }
  0xc0   : > { %v684_v21 = vpop.eup %683  ;;  %466 = vst [vmem:[%s930_s10 + $0x10] sm:$0xff] %v458_v19 }
  0xc1   : > { %v686_v23 = vpop.eup %685  ;;  %v406_v24 = vadd.f32 1.0, %v684_v21  ;;  %v459_v25 = vadd.f32 %v444_v14, %v427_v20 }
  0xc2   : > { %v688_v26 = vpop.eup %687  ;;  %v420_v27 = vmul.f32 %v686_v23, %v372_v22 }
  0xc3   : > { %v690_v29 = vpop.eup %689  ;;  %691 = vrcp.f32 %v406_v24  ;;  %v407_v31 = vadd.f32 1.0, %v688_v26  ;;  %467 = vst [vmem:[%s930_s10 + $0x18] sm:$0xff] %v459_v25 }
  0xc4   : > { %v421_v32 = vmul.f32 %v690_v29, %v373_v28  ;;  %v428_v33 = vmul.f32 0.5, %v420_v27 }
  0xc5   : > { %693 = vrcp.f32 %v407_v31 }
  0xc6   : > { %v429_v36 = vmul.f32 0.5, %v421_v32  ;;  %v460_v37 = vadd.f32 %v449_v34, %v428_v33 }
  0xc8   : > { %v461_v39 = vadd.f32 %v449_v34, %v429_v36  ;;  %468 = vst [vmem:[%s930_s10 + $0x20] sm:$0xff] %v460_v37 }
  0xc9   : > { %v692_v41 = vpop.eup %691 }
  0xca   : > { %469 = vst [vmem:[%s930_s10 + $0x28] sm:$0xff] %v461_v39  ;;  %v422_v42 = vmul.f32 %v692_v41, %v374_v40 }
  0xcb   : > { %v694_v44 = vpop.eup %693 }
  0xcc   : > { %v430_v45 = vmul.f32 0.5, %v422_v42  ;;  %v423_v46 = vmul.f32 %v694_v44, %v375_v43 }
  0xce   : > { %v462_v48 = vadd.f32 %v454_v47, %v430_v45  ;;  %v431_v49 = vmul.f32 0.5, %v423_v46 }
  0xd0   : > { %470 = vst [vmem:[%s930_s10 + $0x30] sm:$0xff] %v462_v48  ;;  %v463_v50 = vadd.f32 %v454_v47, %v431_v49 }
  0xd2   : > { %471 = vst [vmem:[%s930_s10 + $0x38] sm:$0xff] %v463_v50 }
  0xd3   : > { %722 = shalt.err (!%p719_p5)
}
  0xd4   : > { %s776_s8 = smov 256   ;;  %s777_s9 = smov 16  }
  0xd5   : > { %602 = dma.vmem_to_hbm [thread:$0]  (%p843_p4), %s488_s18, 1024, %s490_s21, %s473_s22, %s776_s8, %s776_s8, %s777_s9  }
  0xd6 PF: > { %p608_p6 = scmp.ge.s32.totalorder %s773_s20, 2  ;;  %s504_s10 = sand.u32 1, %s753_s15  }
  0xd7   : > { %s505_s11 = scalar_lea.sflag [#allocation3], %s504_s10 }
  0xd8   : > { %p605_p7 = pnand %p608_p6, %p850_p8 }
  0xda   : > { %p606_p9 = pneg %p605_p7 }
  0xdc   : > { %748 = dma.done.wait (%p606_p9), %s505_s11, 1024  }
  0xdd   : > { %750 = vsyncadd (%p606_p9), %s505_s11, 4294966272  ;;  %s17_s20 = sadd.s32 1, %s773_s20   ;;  %s986_s15 = smov %s757_s16 }
  0xde   : > { %p14_p10 = scmp.ge.s32.totalorder %s17_s20, 4   ;;  %s987_s16 = smov %s761_s17 }
  0xdf   : > { %s988_s17 = smov %s856_s28  ;;  %s989_s18 = smov %s769_s19 }
  0xe0   : > { %s990_s19 = smov %s992_s23  ;;  %16 = sbr.rel (!%p14_p10) target bundleno = 4 (0x4), region = 71 }
  0xe5   :  { %511 = vsyncpa [#allocation3], 1 }
  0xe6   :  { %513 = vsyncpa [#allocation3 + $0x1], 1 }

</bundles_post_ra>
